<compile_context>
chip_gen: v6e
topology: v6e:2x2x1
jax: 0.10.0
libtpu: 0.0.40
codegen_flags: <defaults>
</compile_context>

<pallas_src>
import functools

import jax
import jax.numpy as jnp
from jax import lax
from jax.experimental import pallas as pl
from jax.experimental.pallas import tpu as pltpu


def _round_up(x: int, m: int) -> int:
    return ((x + m - 1) // m) * m


def _kl_loss_tile_kernel(x_ref, t_ref, o_ref, *, inv_temp, n_rows, n_cols,
                         tile_b, mask_rows, mask_cols):
    f32 = jnp.float32
    x = x_ref[...].astype(f32) * inv_temp          # student logits / T
    t = t_ref[...].astype(f32) * inv_temp          # teacher logits / T

    # Student: log_softmax over the class axis (axis=1), per-row log of lse.
    x_sh = x - jnp.max(x, axis=1, keepdims=True)
    log_p = x_sh - jnp.log(jnp.sum(jnp.exp(x_sh), axis=1, keepdims=True))

    # Teacher: softmax (+1e-7 multiplicand, as in PyTorch) and log_softmax.
    # One per-row reciprocal + VPU multiply instead of a per-element divide,
    # one per-row log instead of a per-element log(q).
    t_sh = t - jnp.max(t, axis=1, keepdims=True)
    t_exp = jnp.exp(t_sh)
    t_sum = jnp.sum(t_exp, axis=1, keepdims=True)
    # approx=True would use the EUP fast reciprocal (~1e-4 rel. error); keep
    # the exact reciprocal for loss-level fidelity to PyTorch.
    q = t_exp * pl.reciprocal(t_sum, approx=False) + 1e-7
    log_q = t_sh - jnp.log(t_sum)

    kl = q * (log_q - log_p)                       # fused; few live block temps

    # Mask padded classes / padded batch rows (statically elided when the
    # wrapper did not need to pad).
    valid = None
    if mask_cols:
        col = lax.broadcasted_iota(jnp.int32, kl.shape, 1)
        valid = col < n_cols
    if mask_rows:
        row = (lax.broadcasted_iota(jnp.int32, kl.shape, 0)
               + pl.program_id(0) * tile_b)
        rmask = row < n_rows
        valid = rmask if valid is None else (valid & rmask)
    if valid is not None:
        kl = jnp.where(valid, kl, 0.0)

    # Lane-dense per-tile partial sum (each grid step owns its own block, so
    # the "parallel" grid axis is megacore-safe).  The wrapper reads lane 0.
    o_ref[...] = jnp.full((1, 1, 128), jnp.sum(kl), f32)


def kl_loss(output_batch: jax.Array, teacher_outputs: jax.Array,
            temperature: float = 1.0) -> jax.Array:
    """Pallas KL distillation loss. Inputs: (B, C) logits. Returns scalar f32."""
    assert output_batch.shape == teacher_outputs.shape
    assert output_batch.ndim == 2
    B, C = output_batch.shape
    T = float(temperature)

    # Lane-dense class axis.
    C_pad = _round_up(C, 128)
    itemsize = max(jnp.dtype(output_batch.dtype).itemsize,
                   jnp.dtype(teacher_outputs.dtype).itemsize)

    # Tile sizing against a VMEM budget: 2 inputs x 2 pipeline buffers in the
    # input dtype plus ~8 f32 block-sized temporaries inside the body.
    # 20 MiB working budget + 32 MiB scoped-VMEM limit is safe on v5e/v6e
    # (128 MiB VMEM) and on v7x (64 MiB physical).
    per_row_bytes = C_pad * (4 * itemsize + 8 * 4)
    budget = 20 * 1024 * 1024
    tile_b = max(8, min(512, (budget // max(per_row_bytes, 1)) // 8 * 8))
    tile_b = min(tile_b, _round_up(B, 8))
    B_pad = _round_up(B, tile_b)
    num_tiles = B_pad // tile_b
    # TODO(synk): for extremely wide class axes (where even 8 rows exceed the
    # VMEM budget) the class axis itself would need tiling with an online
    # log-sum-exp formulation.

    NEG = -1e30  # padded class logits -> exp() underflows to exactly 0
    x, t = output_batch, teacher_outputs
    if C_pad != C:
        x = jnp.pad(x, ((0, 0), (0, C_pad - C)), constant_values=NEG)
        t = jnp.pad(t, ((0, 0), (0, C_pad - C)), constant_values=NEG)
    if B_pad != B:
        x = jnp.pad(x, ((0, B_pad - B), (0, 0)))
        t = jnp.pad(t, ((0, B_pad - B), (0, 0)))

    kernel = functools.partial(
        _kl_loss_tile_kernel,
        inv_temp=1.0 / T, n_rows=B, n_cols=C, tile_b=tile_b,
        mask_rows=(B_pad != B), mask_cols=(C_pad != C))

    cost = pl.CostEstimate(
        flops=12 * B_pad * C_pad,
        transcendentals=2 * B_pad * C_pad + 3 * B_pad,
        bytes_accessed=2 * B_pad * C_pad * itemsize + num_tiles * 128 * 4)

    partials = pl.pallas_call(
        kernel,
        grid=(num_tiles,),
        in_specs=[
            pl.BlockSpec((tile_b, C_pad), lambda i: (i, 0)),
            pl.BlockSpec((tile_b, C_pad), lambda i: (i, 0)),
        ],
        out_specs=pl.BlockSpec((1, 1, 128), lambda i: (i, 0, 0)),
        out_shape=jax.ShapeDtypeStruct((num_tiles, 1, 128), jnp.float32),
        compiler_params=pltpu.CompilerParams(
            dimension_semantics=("parallel",),
            vmem_limit_bytes=32 * 1024 * 1024),
        cost_estimate=cost,
    )(x, t)

    # Tiny final reduction + the hoisted T*T / B scalar scaling.
    return jnp.sum(partials[:, 0, 0]) * (T * T / B)


def _kl_loss_ref(output_batch, teacher_outputs, temperature=1.0):
    """Pure-JAX reference mirroring the PyTorch module exactly."""
    T = temperature
    log_p = jax.nn.log_softmax(output_batch / T, axis=1)
    q = jax.nn.softmax(teacher_outputs / T, axis=1) + 1e-7
    B = output_batch.shape[0]
    return T * T * jnp.sum(q * (jnp.log(q) - log_p)) / B


if __name__ == "__main__":
    key = jax.random.PRNGKey(0)
    k1, k2, k3, k4 = jax.random.split(key, 4)

    # Case 1: module-default temperature, 128-unaligned class axis (col mask).
    B1, C1 = 8, 32
    s1 = jax.random.normal(k1, (B1, C1), dtype=jnp.float32)
    t1 = jax.random.normal(k2, (B1, C1), dtype=jnp.float32)
    loss1 = kl_loss(s1, t1, temperature=1.0)
    jax.block_until_ready(loss1)
    ref1 = _kl_loss_ref(s1, t1, temperature=1.0)
    assert jnp.allclose(loss1, ref1, rtol=1e-4, atol=5e-5), (loss1, ref1)

    # Case 2: ragged batch + temperature != 1 (exercises row and col masking).
    B2, C2 = 5, 10
    s2 = jax.random.normal(k3, (B2, C2), dtype=jnp.float32)
    t2 = jax.random.normal(k4, (B2, C2), dtype=jnp.float32)
    loss2 = kl_loss(s2, t2, temperature=2.0)
    jax.block_until_ready(loss2)
    ref2 = _kl_loss_ref(s2, t2, temperature=2.0)
    assert jnp.allclose(loss2, ref2, rtol=1e-4, atol=5e-5), (loss2, ref2)

    print("KERNEL_OK")
</pallas_src>

<mosaic_0001>
module attributes {stable_mosaic.version = 11 : i64} {
  func.func @_kl_loss_tile_kernel(%arg0: i32, %arg1: memref<8x128xf32, #tpu.memory_space<vmem>>, %arg2: memref<8x128xf32, #tpu.memory_space<vmem>>, %arg3: memref<1x1x128xf32, #tpu.memory_space<vmem>>) attributes {dimension_semantics = [#tpu.dimension_semantics<parallel>], iteration_bounds = array<i64: 1>, scalar_prefetch = 0 : i64, scratch_operands = 0 : i64, tpu.core_type = #tpu.core_type<tc>, window_params = [{transform_indices = @transform_0, window_bounds = array<i64: 8, 128>}, {transform_indices = @transform_1, window_bounds = array<i64: 8, 128>}, {transform_indices = @transform_2, window_bounds = array<i64: 1, 1, 128>}]} {
    %c0 = arith.constant 0 : index
    %c0_0 = arith.constant 0 : index
    %0 = vector.load %arg1[%c0, %c0_0] : memref<8x128xf32, #tpu.memory_space<vmem>>, vector<8x128xf32>
    %cst = arith.constant 1.000000e+00 : f32
    %1 = vector.broadcast %cst : f32 to vector<8x128xf32>
    %2 = arith.mulf %0, %1 : vector<8x128xf32>
    %c0_1 = arith.constant 0 : index
    %c0_2 = arith.constant 0 : index
    %3 = vector.load %arg2[%c0_1, %c0_2] : memref<8x128xf32, #tpu.memory_space<vmem>>, vector<8x128xf32>
    %cst_3 = arith.constant 1.000000e+00 : f32
    %4 = vector.broadcast %cst_3 : f32 to vector<8x128xf32>
    %5 = arith.mulf %3, %4 : vector<8x128xf32>
    %cst_4 = arith.constant dense<0xFF800000> : vector<8xf32>
    %6 = vector.multi_reduction <maximumf>, %2, %cst_4 [1] : vector<8x128xf32> to vector<8xf32>
    %7 = vector.shape_cast %6 : vector<8xf32> to vector<8x1xf32>
    %8 = vector.broadcast %7 : vector<8x1xf32> to vector<8x128xf32>
    %9 = arith.subf %2, %8 : vector<8x128xf32>
    %10 = math.exp %9 : vector<8x128xf32>
    %cst_5 = arith.constant dense<0.000000e+00> : vector<8xf32>
    %11 = vector.multi_reduction <add>, %10, %cst_5 [1] : vector<8x128xf32> to vector<8xf32>
    %12 = vector.shape_cast %11 : vector<8xf32> to vector<8x1xf32>
    %13 = math.log %12 : vector<8x1xf32>
    %14 = vector.broadcast %13 : vector<8x1xf32> to vector<8x128xf32>
    %15 = arith.subf %9, %14 : vector<8x128xf32>
    %cst_6 = arith.constant dense<0xFF800000> : vector<8xf32>
    %16 = vector.multi_reduction <maximumf>, %5, %cst_6 [1] : vector<8x128xf32> to vector<8xf32>
    %17 = vector.shape_cast %16 : vector<8xf32> to vector<8x1xf32>
    %18 = vector.broadcast %17 : vector<8x1xf32> to vector<8x128xf32>
    %19 = arith.subf %5, %18 : vector<8x128xf32>
    %20 = math.exp %19 : vector<8x128xf32>
    %cst_7 = arith.constant dense<0.000000e+00> : vector<8xf32>
    %21 = vector.multi_reduction <add>, %20, %cst_7 [1] : vector<8x128xf32> to vector<8xf32>
    %22 = vector.shape_cast %21 : vector<8xf32> to vector<8x1xf32>
    %23 = tpu.reciprocal %22 : vector<8x1xf32> -> vector<8x1xf32>
    %24 = vector.broadcast %23 : vector<8x1xf32> to vector<8x128xf32>
    %25 = arith.mulf %20, %24 : vector<8x128xf32>
    %cst_8 = arith.constant 1.000000e-07 : f32
    %26 = vector.broadcast %cst_8 : f32 to vector<8x128xf32>
    %27 = arith.addf %25, %26 : vector<8x128xf32>
    %28 = math.log %22 : vector<8x1xf32>
    %29 = vector.broadcast %28 : vector<8x1xf32> to vector<8x128xf32>
    %30 = arith.subf %19, %29 : vector<8x128xf32>
    %31 = arith.subf %30, %15 : vector<8x128xf32>
    %32 = arith.mulf %27, %31 : vector<8x128xf32>
    %33 = tpu.iota {dimensions = array<i32: 1>} : vector<8x128xi32>
    %c32_i32 = arith.constant 32 : i32
    %34 = vector.broadcast %c32_i32 : i32 to vector<8x128xi32>
    %35 = arith.cmpi slt, %33, %34 : vector<8x128xi32>
    %cst_9 = arith.constant 0.000000e+00 : f32
    %36 = vector.broadcast %cst_9 : f32 to vector<8x128xf32>
    %37 = arith.select %35, %32, %36 : vector<8x128xi1>, vector<8x128xf32>
    %38 = vector.shape_cast %37 : vector<8x128xf32> to vector<1x8x128xf32>
    %cst_10 = arith.constant dense<0.000000e+00> : vector<1xf32>
    %39 = vector.multi_reduction <add>, %38, %cst_10 [1, 2] : vector<1x8x128xf32> to vector<1xf32>
    %40 = vector.shape_cast %39 : vector<1xf32> to vector<1x1x1xf32>
    %41 = vector.extract %40[0, 0, 0] : f32 from vector<1x1x1xf32>
    %42 = vector.broadcast %41 : f32 to vector<1x1x128xf32>
    %c0_11 = arith.constant 0 : index
    %c0_12 = arith.constant 0 : index
    %c0_13 = arith.constant 0 : index
    %43 = vector.load %arg3[%c0_11, %c0_12, %c0_13] : memref<1x1x128xf32, #tpu.memory_space<vmem>>, vector<1x1x128xf32>
    tpu.vector_store %arg3[%c0_11, %c0_12, %c0_13], %42 {strides = array<i32>} : memref<1x1x128xf32, #tpu.memory_space<vmem>>, vector<1x1x128xf32>,
    return
  }
  func.func @transform_0(%arg0: i32) -> (i32, i32) {
    %c0_i32 = arith.constant 0 : i32
    %c0_i32_0 = arith.constant 0 : i32
    return %arg0, %c0_i32 : i32, i32
  }
  func.func @transform_1(%arg0: i32) -> (i32, i32) {
    %c0_i32 = arith.constant 0 : i32
    %c0_i32_0 = arith.constant 0 : i32
    return %arg0, %c0_i32 : i32, i32
  }
  func.func @transform_2(%arg0: i32) -> (i32, i32, i32) {
    %c0_i32 = arith.constant 0 : i32
    %c0_i32_0 = arith.constant 0 : i32
    %c0_i32_1 = arith.constant 0 : i32
    return %arg0, %c0_i32, %c0_i32_0 : i32, i32, i32
  }
}

</mosaic_0001>

<bundles_post_ra>
// kernel: tpu_custom_call.1
= control target key start
LH: loop header
LB: loop body
LE: loop exit
PB: predicated region body
PF: predicated region fallthrough
CT: control target
= control target key end

     0   :  { %7 = vsyncpa [#allocation3], 0  ;;  %s202_s0 = inlined_call_operand.hbm [shape: f32[8,128], index: 0, kind: input, shape index: {}]   ;;  %s203_s1 = inlined_call_operand.hbm [shape: f32[8,128], index: 1, kind: input, shape index: {}]   ;;  %s204_s2 = inlined_call_operand.hbm [shape: f32[1,1,128], index: 2, kind: output, shape index: {}]  }
   0x1   :  { %8 = vsyncpa [#allocation6], 0 }
   0x2   :  { %9 = vsyncpa [#allocation4], 0  ;;  %s175_s9 = smov [#allocation2]   ;;  %s176_s11 = smov [#allocation5]  }
   0x3   :  { %s16_s10 = sshll.u32 %s175_s9, 4  ;;  %s26_s12 = sshll.u32 %s176_s11, 4  ;;  %s17_s10 = int_to_ptr.vmem [resolvable:$true] %s16_s10  ;;  %s27_s12 = int_to_ptr.vmem [resolvable:$true] %s26_s12 }
   0x4   :  { %s117_s13 = scalar_lea.vmem %s17_s10, 128  ;;  %p122_p1 = scmp.lt.s32.totalorder %s17_s10, %s17_s10 }
   0x5   :  { %p118_p0 = scmp.ne.s32.totalorder %s17_s10, %s117_s13  ;;  %p123_p2 = scmp.lt.s32.totalorder %s117_s13, %s117_s13 }
   0x7   :  { %p124_p3 = por %p123_p2, %p122_p1 }
   0x9   :  { %p125_p4 = pnand %p124_p3, %p118_p0 }
   0xb   :  { %128 = shalt.err (!%p125_p4)
}
   0xc   :  { %19 = dma.hbm_to_vmem [thread:$0]  %s202_s0, 128, %s17_s10, [#allocation3]  }
   0xd   :  { %s137_s16 = scalar_lea.vmem %s27_s12, 128  ;;  %p142_p6 = scmp.lt.s32.totalorder %s27_s12, %s27_s12 }
   0xe   :  { %p138_p5 = scmp.ne.s32.totalorder %s27_s12, %s137_s16  ;;  %p143_p7 = scmp.lt.s32.totalorder %s137_s16, %s137_s16 }
  0x10   :  { %p144_p8 = por %p143_p7, %p142_p6 }
  0x12   :  { %p145_p9 = pnand %p144_p8, %p138_p5 }
  0x14   :  { %148 = shalt.err (!%p145_p9)
}
  0x15   :  { %29 = dma.hbm_to_vmem [thread:$0]  %s203_s1, 128, %s27_s12, [#allocation6]  }
  0x16   :  { %169 = dma.done.wait [#allocation3], 128  }
  0x17   :  { %170 = vsyncadd [#allocation3], 4294967168 }
  0x18   :  { %171 = dma.done.wait [#allocation6], 128  }
  0x19   :  { %172 = vsyncadd [#allocation6], 4294967168  ;;  %v36_v0 = vld [vmem:[#allocation2] sm:$0xff]  ;;  %v37_v1 = vld [vmem:[#allocation5] sm:$0xff]  ;;  %v63_v13 = vlaneseq  ;;  %s177_s0 = smov [#allocation7]  }
  0x1a   :  { %38 = vmax.xlane.f32.xlu0 %v36_v0  ;;  %s84_s1 = sshll.u32 %s177_s0, 4  ;;  %s85_s1 = int_to_ptr.vmem [resolvable:$true] %s84_s1 }
  0x1b   :  { %v64_v19 = vand.u32 127, %v63_v13  ;;  %s149_s20 = scalar_lea.vmem %s85_s1, 16  ;;  %s153_s21 = scalar_lea.vmem %s85_s1, 32 }
  0x1c   :  { %p150_p10 = scmp.ne.s32.totalorder %s85_s1, %s149_s20  ;;  %p154_p11 = scmp.lt.s32.totalorder %s85_s1, %s85_s1 }
  0x1d   :  { %vm65_vm0 = vcmp.lt.s32.totalorder %v64_v19, 32  ;;  %p155_p12 = scmp.lt.s32.totalorder %s153_s21, %s149_s20 }
  0x1e   :  { %48 = vmax.xlane.f32.xlu0 %v37_v1 }
  0x1f   :  { %p156_p13 = por %p155_p12, %p154_p11 }
  0x21   :  { %p157_p0 = pnand %p156_p13, %p150_p10 }
  0xa3   :  { %v39_v2 = vpop.xlane.xlu0 %38 }
  0xa4   :  { %v40_v3 = vsub.f32 %v36_v0, %v39_v2 }
  0xa6   :  { %v41_v4 = vmul.f32 1.442695, %v40_v3 }
  0xa7   :  { %v49_v5 = vpop.xlane.xlu0 %48 }
  0xa8   :  { %v50_v6 = vsub.f32 %v37_v1, %v49_v5  ;;  %99 = vpow2.f32 %v41_v4 }
  0xaa   :  { %v51_v7 = vmul.f32 1.442695, %v50_v6 }
  0xac   :  { %101 = vpow2.f32 %v51_v7 }
  0xb5   :  { %v100_v8 = vpop.eup %99 }
  0xb6   :  { %43 = vadd.xlane.f32.xlu1 %v100_v8 }
  0xb9   :  { %v102_v9 = vpop.eup %101 }
  0xba   :  { %53 = vadd.xlane.f32.xlu1 %v102_v9 }
 0x13f   :  { %v44_v10 = vpop.xlane.xlu1 %43 }
 0x140   :  { %103 = vlog2.f32 %v44_v10 }
 0x143   :  { %v54_v11 = vpop.xlane.xlu1 %53 }
 0x144   :  { %105 = vrcp.f32 %v54_v11 }
 0x145   :  { %107 = vlog2.f32 %v54_v11 }
 0x14d   :  { %v104_v12 = vpop.eup %103 }
 0x14e   :  { %v46_v15 = vmul.f32 0.6931472, %v104_v12 }
 0x150   :  { %v47_v20 = vsub.f32 %v40_v3, %v46_v15 }
 0x151   :  { %v106_v14 = vpop.eup %105 }
 0x152   :  { %v108_v16 = vpop.eup %107  ;;  %v56_v18 = vmul.f32 %v106_v14, %v102_v9 }
 0x153   :  { %v59_v17 = vmul.f32 0.6931472, %v108_v16 }
 0x154   :  { %v57_v22 = vadd.f32 1e-07, %v56_v18 }
 0x155   :  { %v60_v21 = vsub.f32 %v50_v6, %v59_v17 }
 0x157   :  { %v61_v23 = vsub.f32 %v60_v21, %v47_v20 }
 0x159   :  { %v62_v24 = vmul.f32 %v61_v23, %v57_v22 }
 0x15b   :  { %v66_v25 = vsel %vm65_vm0, %v62_v24, 0.0 }
 0x15c   :  { %67 = vadd.xlane.f32.xlu0 %v66_v25 }
 0x1e5   :  { %v68_v26 = vpop.xlane.xlu0 %67 }
 0x1e6   :  { %v69_v27 = vrot.slane %v68_v26, 4 }
 0x1e8   :  { %v70_v28 = vadd.f32 %v69_v27, %v68_v26 }
 0x1ea   :  { %v71_v29 = vrot.slane %v70_v28, 2 }
 0x1ec   :  { %v72_v30 = vadd.f32 %v71_v29, %v70_v28 }
 0x1ee   :  { %v73_v31 = vrot.slane %v72_v30, 1 }
 0x1f0   :  { %v74_v32 = vadd.f32 %v73_v31, %v72_v30 }
 0x1f2   :  { %94 = vpush %v74_v32 }
 0x223   :  { %s95_s19 = spop %94 }
 0x224   :  { %v76_v33 = vstv %s95_s19 }
 0x225   :  { %77 = vst [vmem:[#allocation7] sm:$0x1] %v76_v33 }
 0x226   :  { %160 = shalt.err (!%p157_p0)
}
 0x227   :  { %87 = dma.vmem_to_hbm [thread:$0]  %s85_s1, 16, %s204_s2, [#allocation4]  }
 0x228   :  { %173 = dma.done.wait [#allocation4], 16  }
 0x229   :  { %174 = vsyncadd [#allocation4], 4294967280 }
 0x22a   :  { %91 = vsyncpa [#allocation3], 1 }
 0x22b   :  { %92 = vsyncpa [#allocation6], 1 }
 0x22c   :  { %93 = vsyncpa [#allocation4], 1 }

</bundles_post_ra>
